<compile_context>
chip_gen: v7x
topology: tpu7x:2x2x1
jax: 0.10.0
libtpu: 0.0.40
codegen_flags: <defaults>
</compile_context>

<pallas_src>
import functools
import math

import jax
import jax.numpy as jnp
from jax.experimental import pallas as pl
from jax.experimental.pallas import tpu as pltpu

_VMEM_LIMIT_BYTES = 64 * 1024 * 1024


# ---------------------------------------------------------------------------
# Tiling selection
# ---------------------------------------------------------------------------
def _choose_tiling(n, itemsize):
    """Pick (block_rows, lane) for a flattened slab of n elements."""
    # Sublane granularity: keep packed vregs full for 16-/8-bit dtypes.
    sub = {4: 8, 2: 16, 1: 32}.get(int(itemsize), 8)
    # Wide lane dim for large tensors -> unmasked full-width vst / long DMAs.
    lane = 512 if n >= (1 << 20) else 128
    max_rows = 1024  # 1024 * 512 * 4 B = 2 MiB f32 per block per input
    rows_needed = pl.cdiv(n, lane)
    block_rows = min(max_rows, pl.cdiv(rows_needed, sub) * sub)
    return block_rows, lane


# ---------------------------------------------------------------------------
# Kernels
# ---------------------------------------------------------------------------
def _l1_sum_kernel(p_ref, t_ref, o_ref, acc_ref):
    """Partial sum of |pred - target| over the inner (arbitrary) grid axis."""
    i = pl.program_id(1)

    @pl.when(i == 0)
    def _init():
        acc_ref[...] = jnp.zeros_like(acc_ref)

    d = jnp.abs(p_ref[...].astype(jnp.float32) - t_ref[...].astype(jnp.float32))
    # Reduce only the sublane/block-row axis each step (VPU adds + one tiny
    # sublane fold); the cross-lane reduce happens once on the host.
    acc_ref[...] += jnp.sum(d, axis=0, keepdims=True)

    @pl.when(i == pl.num_programs(1) - 1)
    def _fini():
        o_ref[0] = acc_ref[...]


def _l1_sum_weighted_kernel(p_ref, t_ref, w_ref, o_ref, acc_ref):
    """Partial sum of |pred - target| * weight over the inner grid axis."""
    i = pl.program_id(1)

    @pl.when(i == 0)
    def _init():
        acc_ref[...] = jnp.zeros_like(acc_ref)

    d = jnp.abs(p_ref[...].astype(jnp.float32) - t_ref[...].astype(jnp.float32))
    d = d * w_ref[...].astype(jnp.float32)
    acc_ref[...] += jnp.sum(d, axis=0, keepdims=True)

    @pl.when(i == pl.num_programs(1) - 1)
    def _fini():
        o_ref[0] = acc_ref[...]


def _l1_none_kernel(p_ref, t_ref, o_ref, *, scale):
    d = jnp.abs(p_ref[...] - t_ref[...])
    if scale != 1.0:  # loss_weight folded into the kernel (no extra HBM pass)
        d = d * jnp.asarray(scale, d.dtype)
    o_ref[...] = d.astype(o_ref.dtype)


def _l1_none_weighted_kernel(p_ref, t_ref, w_ref, o_ref, *, scale):
    d = jnp.abs(p_ref[...] - t_ref[...]) * w_ref[...]
    if scale != 1.0:
        d = d * jnp.asarray(scale, d.dtype)
    o_ref[...] = d.astype(o_ref.dtype)


# ---------------------------------------------------------------------------
# Host-side wrapper
# ---------------------------------------------------------------------------
def l1_loss_pallas(pred, target, weight=None, loss_weight=1.0, reduction="mean"):
    """Pallas equivalent of basicsr L1Loss.forward.

    pred/target/weight: arrays of identical shape (e.g. NCHW).
    Returns a scalar for 'mean'/'sum' (note: 'mean' divides by numel even when
    a weight is supplied, matching basicsr's avg_factor=None path), or an
    array of pred.shape for 'none'.
    """
    if reduction not in ("none", "mean", "sum"):
        raise ValueError(f"Unsupported reduction mode: {reduction}")
    assert pred.shape == target.shape
    if weight is not None:
        assert weight.shape == pred.shape

    orig_shape = pred.shape
    orig_dtype = pred.dtype
    n = int(math.prod(orig_shape)) if orig_shape else 1

    block_rows, lane = _choose_tiling(n, jnp.dtype(orig_dtype).itemsize)
    tile_elems = block_rows * lane
    padded_n = pl.cdiv(n, tile_elems) * tile_elems
    pad = padded_n - n
    rows = padded_n // lane
    nblocks = rows // block_rows

    def _to_slab(x):
        flat = x.reshape(-1)
        if pad:
            # TODO(synk): replace this host-side zero-pad (extra HBM pass for
            # ragged sizes) with in-kernel tail masking; zero padding is exact
            # for L1 (|0-0| == 0, weight pads to 0).
            flat = jnp.pad(flat, (0, pad))
        return flat.reshape(rows, lane)

    inputs = [_to_slab(pred), _to_slab(target)]
    if weight is not None:
        inputs.append(_to_slab(weight))

    if reduction == "none":
        kernel = functools.partial(
            _l1_none_weighted_kernel if weight is not None else _l1_none_kernel,
            scale=float(loss_weight))
        tile = pl.BlockSpec((block_rows, lane), lambda i: (i, 0))
        out2d = pl.pallas_call(
            kernel,
            out_shape=jax.ShapeDtypeStruct((rows, lane), orig_dtype),
            grid=(nblocks,),
            in_specs=[tile] * len(inputs),
            out_specs=tile,
            compiler_params=pltpu.CompilerParams(
                dimension_semantics=("parallel",),
                vmem_limit_bytes=_VMEM_LIMIT_BYTES),
        )(*inputs)
        if pad:
            return out2d.reshape(-1)[:n].reshape(orig_shape)
        return out2d.reshape(orig_shape)

    # 'mean' or 'sum': per-core partial sums, combined on the host.
    nsplit = 2 if (nblocks >= 2 and nblocks % 2 == 0) else 1
    inner = nblocks // nsplit
    kernel = _l1_sum_weighted_kernel if weight is not None else _l1_sum_kernel
    in_spec = pl.BlockSpec((block_rows, lane), lambda c, i: (c * inner + i, 0))
    partials = pl.pallas_call(
        kernel,
        out_shape=jax.ShapeDtypeStruct((nsplit, 1, lane), jnp.float32),
        grid=(nsplit, inner),
        in_specs=[in_spec] * len(inputs),
        out_specs=pl.BlockSpec((1, 1, lane), lambda c, i: (c, 0, 0)),
        scratch_shapes=[pltpu.VMEM((1, lane), jnp.float32)],
        compiler_params=pltpu.CompilerParams(
            dimension_semantics=("parallel", "arbitrary"),
            vmem_limit_bytes=_VMEM_LIMIT_BYTES),
    )(*inputs)

    total = jnp.sum(partials)  # tiny (<= 2*512 f32) host-side combine
    scale = float(loss_weight) / n if reduction == "mean" else float(loss_weight)
    return (total * jnp.float32(scale)).astype(orig_dtype)


class L1LossPallas:
    """Mirror of basicsr L1Loss (forward only)."""

    def __init__(self, loss_weight=1.0, reduction="mean"):
        if reduction not in ("none", "mean", "sum"):
            raise ValueError(f"Unsupported reduction mode: {reduction}")
        self.loss_weight = loss_weight
        self.reduction = reduction

    def __call__(self, pred, target, weight=None):
        return l1_loss_pallas(pred, target, weight,
                              loss_weight=self.loss_weight,
                              reduction=self.reduction)


# ---------------------------------------------------------------------------
# Demo / self-check
# ---------------------------------------------------------------------------
if __name__ == "__main__":
    key = jax.random.PRNGKey(0)
    k1, k2, k3 = jax.random.split(key, 3)

    N, C, H, W = 2, 4, 16, 16
    pred = jax.random.normal(k1, (N, C, H, W), dtype=jnp.float32)
    target = jax.random.normal(k2, (N, C, H, W), dtype=jnp.float32)
    weight = jax.random.uniform(k3, (N, C, H, W), dtype=jnp.float32)

    # mean (no weight)
    out_mean = jax.block_until_ready(
        L1LossPallas(loss_weight=1.0, reduction="mean")(pred, target))
    ref_mean = jnp.mean(jnp.abs(pred - target))
    assert jnp.allclose(out_mean, ref_mean, rtol=1e-5, atol=1e-5), (out_mean, ref_mean)

    # sum (with weight)
    out_sum = jax.block_until_ready(
        L1LossPallas(loss_weight=0.5, reduction="sum")(pred, target, weight))
    ref_sum = 0.5 * jnp.sum(jnp.abs(pred - target) * weight)
    assert jnp.allclose(out_sum, ref_sum, rtol=1e-5, atol=1e-4), (out_sum, ref_sum)

    # none
    out_none = jax.block_until_ready(
        L1LossPallas(loss_weight=2.0, reduction="none")(pred, target))
    ref_none = 2.0 * jnp.abs(pred - target)
    assert out_none.shape == (N, C, H, W)
    assert jnp.allclose(out_none, ref_none, rtol=1e-5, atol=1e-5)

    print("KERNEL_OK")
</pallas_src>

<mosaic_0001>
module attributes {stable_mosaic.version = 11 : i64} {
  func.func @_l1_sum_kernel(%arg0: i32, %arg1: i32, %arg2: memref<16x128xf32, #tpu.memory_space<vmem>>, %arg3: memref<16x128xf32, #tpu.memory_space<vmem>>, %arg4: memref<1x1x128xf32, #tpu.memory_space<vmem>>, %arg5: memref<1x128xf32, #tpu.memory_space<vmem>>) attributes {dimension_semantics = [#tpu.dimension_semantics<parallel>, #tpu.dimension_semantics<arbitrary>], iteration_bounds = array<i64: 1, 1>, scalar_prefetch = 0 : i64, scratch_operands = 1 : i64, tpu.core_type = #tpu.core_type<tc>, window_params = [{transform_indices = @transform_0, window_bounds = array<i64: 16, 128>}, {transform_indices = @transform_1, window_bounds = array<i64: 16, 128>}, {transform_indices = @transform_2, window_bounds = array<i64: 1, 1, 128>}]} {
    %c0_i32 = arith.constant 0 : i32
    %0 = arith.cmpi eq, %arg1, %c0_i32 : i32
    %1 = arith.extui %0 : i1 to i32
    %c0_i32_0 = arith.constant 0 : i32
    %2 = arith.cmpi ne, %1, %c0_i32_0 : i32
    scf.if %2 {
      %cst_10 = arith.constant 0.000000e+00 : f32
      %15 = vector.broadcast %cst_10 : f32 to vector<1x128xf32>
      %c0_11 = arith.constant 0 : index
      %c0_12 = arith.constant 0 : index
      %16 = vector.load %arg5[%c0_11, %c0_12] : memref<1x128xf32, #tpu.memory_space<vmem>>, vector<1x128xf32>
      tpu.vector_store %arg5[%c0_11, %c0_12], %15 {strides = array<i32>} : memref<1x128xf32, #tpu.memory_space<vmem>>, vector<1x128xf32>,
    } else {
    }
    %c0 = arith.constant 0 : index
    %c0_1 = arith.constant 0 : index
    %3 = vector.load %arg2[%c0, %c0_1] : memref<16x128xf32, #tpu.memory_space<vmem>>, vector<16x128xf32>
    %c0_2 = arith.constant 0 : index
    %c0_3 = arith.constant 0 : index
    %4 = vector.load %arg3[%c0_2, %c0_3] : memref<16x128xf32, #tpu.memory_space<vmem>>, vector<16x128xf32>
    %5 = arith.subf %3, %4 : vector<16x128xf32>
    %6 = math.absf %5 : vector<16x128xf32>
    %c0_4 = arith.constant 0 : index
    %c0_5 = arith.constant 0 : index
    %7 = vector.load %arg5[%c0_4, %c0_5] : memref<1x128xf32, #tpu.memory_space<vmem>>, vector<1x128xf32>
    %cst = arith.constant dense<0.000000e+00> : vector<128xf32>
    %8 = vector.multi_reduction <add>, %6, %cst [0] : vector<16x128xf32> to vector<128xf32>
    %9 = vector.shape_cast %8 : vector<128xf32> to vector<1x128xf32>
    %10 = arith.addf %7, %9 : vector<1x128xf32>
    %c0_6 = arith.constant 0 : index
    %c0_7 = arith.constant 0 : index
    %11 = vector.load %arg5[%c0_6, %c0_7] : memref<1x128xf32, #tpu.memory_space<vmem>>, vector<1x128xf32>
    tpu.vector_store %arg5[%c0_6, %c0_7], %10 {strides = array<i32>} : memref<1x128xf32, #tpu.memory_space<vmem>>, vector<1x128xf32>,
    %c0_i32_8 = arith.constant 0 : i32
    %12 = arith.cmpi eq, %arg1, %c0_i32_8 : i32
    %13 = arith.extui %12 : i1 to i32
    %c0_i32_9 = arith.constant 0 : i32
    %14 = arith.cmpi ne, %13, %c0_i32_9 : i32
    scf.if %14 {
      %c0_10 = arith.constant 0 : index
      %c0_11 = arith.constant 0 : index
      %15 = vector.load %arg5[%c0_10, %c0_11] : memref<1x128xf32, #tpu.memory_space<vmem>>, vector<1x128xf32>
      %c0_12 = arith.constant 0 : index
      %c0_13 = arith.constant 0 : index
      %c0_14 = arith.constant 0 : index
      %16 = vector.load %arg4[%c0_12, %c0_13, %c0_14] : memref<1x1x128xf32, #tpu.memory_space<vmem>>, vector<1x1x128xf32>
      %17 = vector.shape_cast %16 : vector<1x1x128xf32> to vector<1x128xf32>
      %18 = vector.shape_cast %15 : vector<1x128xf32> to vector<1x1x128xf32>
      tpu.vector_store %arg4[%c0_12, %c0_13, %c0_14], %18 {strides = array<i32>} : memref<1x1x128xf32, #tpu.memory_space<vmem>>, vector<1x1x128xf32>,
    } else {
    }
    return
  }
  func.func @transform_0(%arg0: i32, %arg1: i32) -> (i32, i32) {
    %c1_i32 = arith.constant 1 : i32
    %0 = arith.muli %arg0, %c1_i32 : i32
    %1 = arith.addi %0, %arg1 : i32
    %c0_i32 = arith.constant 0 : i32
    %c0_i32_0 = arith.constant 0 : i32
    return %1, %c0_i32 : i32, i32
  }
  func.func @transform_1(%arg0: i32, %arg1: i32) -> (i32, i32) {
    %c1_i32 = arith.constant 1 : i32
    %0 = arith.muli %arg0, %c1_i32 : i32
    %1 = arith.addi %0, %arg1 : i32
    %c0_i32 = arith.constant 0 : i32
    %c0_i32_0 = arith.constant 0 : i32
    return %1, %c0_i32 : i32, i32
  }
  func.func @transform_2(%arg0: i32, %arg1: i32) -> (i32, i32, i32) {
    %c0_i32 = arith.constant 0 : i32
    %c0_i32_0 = arith.constant 0 : i32
    %c0_i32_1 = arith.constant 0 : i32
    return %arg0, %c0_i32, %c0_i32_0 : i32, i32, i32
  }
}

</mosaic_0001>

<bundles_post_ra>
// kernel: tpu_custom_call.1
= control target key start
LH: loop header
LB: loop body
LE: loop exit
PB: predicated region body
PF: predicated region fallthrough
CT: control target
= control target key end

     0   :  { %7 = vsyncpa [#allocation4], 0  ;;  %s231_s0 = inlined_call_operand.hbm [shape: f32[16,128], index: 0, kind: input, shape index: {}]   ;;  %s232_s1 = inlined_call_operand.hbm [shape: f32[16,128], index: 1, kind: input, shape index: {}]   ;;  %s233_s2 = inlined_call_operand.hbm [shape: f32[1,1,128], index: 2, kind: output, shape index: {}]  }
   0x1   :  { %8 = vsyncpa [#allocation7], 0 }
   0x2   :  { %9 = vsyncpa [#allocation5], 0  ;;  %s174_s9 = smov [#allocation3]   ;;  %s102_s13 = scalar_lea.hbm %s231_s0, 256 }
   0x3   :  { %s19_s10 = sshll.u32 %s174_s9, 4  ;;  %p103_p0 = scmp.ne.s32.totalorder %s231_s0, %s102_s13  ;;  %s20_s10 = int_to_ptr.vmem [resolvable:$true] %s19_s10 }
   0x4   :  { %p106_p1 = scmp.lt.u32.totalorder %s102_s13, %s231_s0 }
   0x6   :  { %p108_p2 = pnand %p106_p1, %p103_p0 }
   0x8   :  { %111 = shalt.err (!%p108_p2)
}
   0x9   :  { %s112_s18 = scalar_lea.vmem %s20_s10, 256  ;;  %p117_p4 = scmp.lt.s32.totalorder %s20_s10, %s20_s10 }
   0xa   :  { %p113_p3 = scmp.ne.s32.totalorder %s20_s10, %s112_s18  ;;  %p118_p5 = scmp.lt.s32.totalorder %s112_s18, %s112_s18 }
   0xc   :  { %p119_p6 = por %p118_p5, %p117_p4 }
   0xe   :  { %p120_p7 = pnand %p119_p6, %p113_p3 }
  0x10   :  { %123 = shalt.err (!%p120_p7)
}
  0x11   :  { %s175_s19 = smov 128   ;;  %s176_s20 = smov 8  }
  0x12   :  { %25 = dma.hbm_to_vmem [thread:$0]  %s231_s0, 256, %s20_s10, [#allocation4], %s175_s19, %s175_s19, %s176_s20  }
  0x13   :  { %s177_s23 = smov [#allocation6]   ;;  %s124_s27 = scalar_lea.hbm %s232_s1, 256 }
  0x14   :  { %s35_s24 = sshll.u32 %s177_s23, 4  ;;  %p125_p8 = scmp.ne.s32.totalorder %s232_s1, %s124_s27  ;;  %s36_s24 = int_to_ptr.vmem [resolvable:$true] %s35_s24 }
  0x15   :  { %p128_p9 = scmp.lt.u32.totalorder %s124_s27, %s232_s1 }
  0x17   :  { %p130_p10 = pnand %p128_p9, %p125_p8 }
  0x19   :  { %133 = shalt.err (!%p130_p10)
}
  0x1a   :  { %s134_s4 = scalar_lea.vmem %s36_s24, 256  ;;  %p139_p12 = scmp.lt.s32.totalorder %s36_s24, %s36_s24 }
  0x1b   :  { %p135_p11 = scmp.ne.s32.totalorder %s36_s24, %s134_s4  ;;  %p140_p13 = scmp.lt.s32.totalorder %s134_s4, %s134_s4 }
  0x1d   :  { %p141_p0 = por %p140_p13, %p139_p12 }
  0x1f   :  { %p142_p1 = pnand %p141_p0, %p135_p11 }
  0x21   :  { %145 = shalt.err (!%p142_p1)
}
  0x22   :  { %41 = dma.hbm_to_vmem [thread:$0]  %s232_s1, 256, %s36_s24, [#allocation7], %s175_s19, %s175_s19, %s176_s20  }
  0x23   :  { %168 = dma.done.wait [#allocation4], 256  }
  0x24   :  { %169 = vsyncadd [#allocation4], 4294967040 }
  0x25   :  { %170 = dma.done.wait [#allocation7], 256  }
  0x26   :  { %171 = vsyncadd [#allocation7], 4294967040  ;;  %v178_v0 = vmov 0.0   ;;  %v57_v1 = vld [vmem:[#allocation3] sm:$0xff]  ;;  %v58_v2 = vld [vmem:[#allocation3 + $0x8] sm:$0xff]  ;;  %s179_s1 = smov [#allocation8]  }
  0x27   :  { %56 = vst [vmem:[#allocation2] sm:$0x1] %v178_v0  ;;  %v59_v3 = vld [vmem:[#allocation6] sm:$0xff]  ;;  %v60_v4 = vld [vmem:[#allocation6 + $0x8] sm:$0xff]  ;;  %s86_s6 = sshll.u32 %s179_s1, 4  ;;  %s87_s6 = int_to_ptr.vmem [resolvable:$true] %s86_s6 }
  0x28   :  { %v61_v5 = vsub.f32 %v57_v1, %v59_v3  ;;  %v62_v6 = vsub.f32 %v58_v2, %v60_v4  ;;  %s146_s7 = scalar_lea.vmem %s87_s6, 16  ;;  %s150_s8 = scalar_lea.vmem %s87_s6, 32 }
  0x29   :  { %p147_p2 = scmp.ne.s32.totalorder %s87_s6, %s146_s7  ;;  %p151_p3 = scmp.lt.s32.totalorder %s87_s6, %s87_s6 }
  0x2a   :  { %v63_v7 = vand.u32 2147483647, %v61_v5  ;;  %v64_v8 = vand.u32 2147483647, %v62_v6  ;;  %p152_p4 = scmp.lt.s32.totalorder %s150_s8, %s146_s7 }
  0x2c   :  { %v66_v9 = vadd.f32 %v64_v8, %v63_v7  ;;  %p153_p5 = por %p152_p4, %p151_p3 }
  0x2e   :  { %v67_v10 = vrot.slane %v66_v9, 4  ;;  %v65_v15 = vld [vmem:[#allocation2] sm:$0x1]  ;;  %p154_p6 = pnand %p153_p5, %p147_p2 }
  0x30   :  { %v68_v11 = vadd.f32 %v67_v10, %v66_v9 }
  0x32   :  { %v69_v12 = vrot.slane %v68_v11, 2 }
  0x34   :  { %v70_v13 = vadd.f32 %v69_v12, %v68_v11 }
  0x36   :  { %v71_v14 = vrot.slane %v70_v13, 1 }
  0x38   :  { %v72_v16 = vadd.f32 %v71_v14, %v70_v13 }
  0x3a   :  { %v73_v17 = vadd.f32 %v72_v16, %v65_v15 }
  0x3c   :  { %74 = vst [vmem:[#allocation2] sm:$0x1] %v73_v17 }
  0x43   :  { %v78_v18 = vld [vmem:[#allocation2] sm:$0x1] }
  0x44   :  { %79 = vst [vmem:[#allocation8] sm:$0x1] %v78_v18 }
  0x45   :  { %157 = shalt.err (!%p154_p6)
}
  0x46   :  { %s158_s11 = scalar_lea.hbm %s233_s2, 16 }
  0x47   :  { %p159_p7 = scmp.ne.s32.totalorder %s233_s2, %s158_s11  ;;  %p162_p8 = scmp.lt.u32.totalorder %s158_s11, %s233_s2 }
  0x49   :  { %p164_p9 = pnand %p162_p8, %p159_p7 }
  0x4b   :  { %167 = shalt.err (!%p164_p9)
}
  0x4c   :  { %89 = dma.vmem_to_hbm [thread:$0]  %s87_s6, 16, %s233_s2, [#allocation5]  }
  0x4d   :  { %172 = dma.done.wait [#allocation5], 16  }
  0x4e   :  { %173 = vsyncadd [#allocation5], 4294967280 }
  0x4f   :  { %93 = vsyncpa [#allocation4], 1 }
  0x50   :  { %94 = vsyncpa [#allocation7], 1 }
  0x51   :  { %95 = vsyncpa [#allocation5], 1 }

</bundles_post_ra>
